<compile_context>
chip_gen: v7x
topology: tpu7x:2x2x1
jax: 0.10.0
libtpu: 0.0.40
codegen_flags: <defaults>
</compile_context>

<pallas_src>
import jax
import jax.numpy as jnp
from jax.experimental import pallas as pl
from jax.experimental.pallas import tpu as pltpu


# ----------------------------------------------------------------------------
# Pallas kernel: fused (GCNConv + Linear head) after weight folding
# ----------------------------------------------------------------------------
def gcn_fused_kernel(b_ref, w_row_ref, x_t_ref, a_t_ref, out_ref, acc_ref):
    k = pl.program_id(1)

    @pl.when(k == 0)
    def _():
        acc_ref[...] = jnp.zeros_like(acc_ref)

    # s_row_k = (X @ w_comb)^T restricted to this contraction tile -> (1, TILE_K)
    s_row = jnp.dot(w_row_ref[...], x_t_ref[...], preferred_element_type=jnp.float32)
    # acc[0, j_block] += s_row_k @ A_hat^T[k_block, j_block]
    acc_ref[...] += jnp.dot(s_row, a_t_ref[...], preferred_element_type=jnp.float32)

    @pl.when(k == pl.num_programs(1) - 1)
    def _():
        # add the folded scalar bias (from SMEM) and emit lane-dense output row
        out_ref[...] = acc_ref[...] + b_ref[0, 0]


# ----------------------------------------------------------------------------
# Wrapper: weight folding, lane-dense padded layout, 2-D tiled grid
# ----------------------------------------------------------------------------
def _round_up(v, m):
    return ((v + m - 1) // m) * m


def _pick_tile(n_pad):
    # Largest tile (multiple of 128, divides n_pad, <= 512); at 512 the
    # double-buffered f32 a_t tile is only 2 MiB, well within any chip's VMEM.
    for cand in (512, 384, 256, 128):
        if cand <= n_pad and n_pad % cand == 0:
            return cand
    return 128


def gcn_regression(a_norm, x, w1, b1, wfc, bfc):
    n, f = x.shape

    # ---- fold the Linear head into the conv weights (no nonlinearity in between) ----
    w_comb = jnp.dot(w1, wfc)                                            # (F, 1)
    b_comb = (jnp.dot(b1, wfc) + bfc).reshape(1, 1).astype(jnp.float32)  # scalar

    # ---- lane-dense, padded, transposed layout (wrapper-side layout plumbing) ----
    n_pad = _round_up(max(n, 128), 128)      # lane-aligned node count
    f_pad = _round_up(f, 8)                  # sublane-aligned feature count
    x_t = jnp.zeros((f_pad, n_pad), jnp.float32).at[:f, :n].set(x.T)        # X^T
    a_t = jnp.zeros((n_pad, n_pad), jnp.float32).at[:n, :n].set(a_norm.T)   # A_hat^T
    w_row = jnp.zeros((1, f_pad), jnp.float32).at[:, :f].set(w_comb.T)      # w_comb^T

    tile = _pick_tile(n_pad)                 # used for both output-column and contraction tiles
    grid = (n_pad // tile, n_pad // tile)    # (output cols "parallel", contraction "arbitrary")

    out_row = pl.pallas_call(
        gcn_fused_kernel,
        out_shape=jax.ShapeDtypeStruct((1, n_pad), jnp.float32),
        grid=grid,
        in_specs=[
            pl.BlockSpec(memory_space=pltpu.MemorySpace.SMEM),       # b_comb scalar in SMEM
            pl.BlockSpec((1, f_pad), lambda j, k: (0, 0)),           # w_row (resident)
            pl.BlockSpec((f_pad, tile), lambda j, k: (0, k)),        # x_t contraction tile
            pl.BlockSpec((tile, tile), lambda j, k: (k, j)),         # a_t (k_block, j_block) tile
        ],
        out_specs=pl.BlockSpec((1, tile), lambda j, k: (0, j)),      # lane-dense output row tile
        scratch_shapes=[pltpu.VMEM((1, tile), jnp.float32)],         # per-column-tile accumulator
        compiler_params=pltpu.CompilerParams(
            dimension_semantics=("parallel", "arbitrary"),           # megacore-shardable (v7x)
        ),
    )(b_comb, w_row, x_t, a_t)

    # back to the module's (N, 1) output
    return out_row[0, :n].reshape(n, 1)


# ----------------------------------------------------------------------------
# Plain-JAX glue: dense symmetric-normalized adjacency from edge_index
# ----------------------------------------------------------------------------
def build_normalized_adjacency(edge_index, num_nodes):
    # Scatter-add keeps per-edge message semantics (duplicate directed edges count
    # multiple times, matching message passing over the given edge list).
    src, dst = edge_index[0], edge_index[1]
    adj = jnp.zeros((num_nodes, num_nodes), jnp.float32)
    adj = adj.at[dst, src].add(1.0)                      # message flows src -> dst
    adj = adj + jnp.eye(num_nodes, dtype=jnp.float32)    # add self-loops
    deg = adj.sum(axis=1)
    dinv = jnp.where(deg > 0, 1.0 / jnp.sqrt(deg), 0.0)
    return dinv[:, None] * adj * dinv[None, :]           # D^{-1/2} (A+I) D^{-1/2}
    # TODO(synk): for very large graphs, replace the dense O(N^2) A_hat with a
    # scalar-prefetched edge-list gather / segment-sum inside the kernel.


# ----------------------------------------------------------------------------
# Main: deterministic params + small synthetic graph
# ----------------------------------------------------------------------------
if __name__ == "__main__":
    N = 64            # number of nodes
    F = 32            # num_features
    H = 16            # hidden_channel
    E = 128           # number of directed edges

    key = jax.random.PRNGKey(0)
    k_x, k_e, k_w1, k_b1, k_wfc, k_bfc = jax.random.split(key, 6)

    x = jax.random.normal(k_x, (N, F), jnp.float32)
    edge_index = jax.random.randint(k_e, (2, E), 0, N, jnp.int32)

    # deterministic parameters, shapes per the module __init__
    w1 = jax.random.normal(k_w1, (F, H), jnp.float32) * (1.0 / jnp.sqrt(F))
    b1 = jax.random.normal(k_b1, (1, H), jnp.float32) * 0.01
    wfc = jax.random.normal(k_wfc, (H, 1), jnp.float32) * (1.0 / jnp.sqrt(H))
    bfc = jax.random.normal(k_bfc, (1, 1), jnp.float32) * 0.01

    a_norm = build_normalized_adjacency(edge_index, N)

    out = jax.block_until_ready(gcn_regression(a_norm, x, w1, b1, wfc, bfc))

    # pure-JAX reference of the ORIGINAL (un-folded) forward pass
    ref = (a_norm @ (x @ w1) + b1) @ wfc + bfc
    assert out.shape == (N, 1)
    assert jnp.allclose(out, ref, atol=1e-4, rtol=1e-4), "mismatch vs reference"

    print("KERNEL_OK")
</pallas_src>

<mosaic_0001>
module attributes {stable_mosaic.version = 11 : i64} {
  func.func @gcn_fused_kernel(%arg0: i32, %arg1: i32, %arg2: memref<1x1xf32, #tpu.memory_space<smem>>, %arg3: memref<1x32xf32, #tpu.memory_space<vmem>>, %arg4: memref<32x128xf32, #tpu.memory_space<vmem>>, %arg5: memref<128x128xf32, #tpu.memory_space<vmem>>, %arg6: memref<1x128xf32, #tpu.memory_space<vmem>>, %arg7: memref<1x128xf32, #tpu.memory_space<vmem>>) attributes {dimension_semantics = [#tpu.dimension_semantics<parallel>, #tpu.dimension_semantics<arbitrary>], iteration_bounds = array<i64: 1, 1>, scalar_prefetch = 0 : i64, scratch_operands = 1 : i64, tpu.core_type = #tpu.core_type<tc>, window_params = [{transform_indices = @transform_0, window_bounds = array<i64: 1, 1>}, {pipeline_mode = #tpu.pipeline_mode<synchronous>, transform_indices = @transform_1, window_bounds = array<i64: 1, 32>}, {transform_indices = @transform_2, window_bounds = array<i64: 32, 128>}, {transform_indices = @transform_3, window_bounds = array<i64: 128, 128>}, {transform_indices = @transform_4, window_bounds = array<i64: 1, 128>}]} {
    %c0_i32 = arith.constant 0 : i32
    %0 = arith.cmpi eq, %arg1, %c0_i32 : i32
    %1 = arith.extui %0 : i1 to i32
    %c0_i32_0 = arith.constant 0 : i32
    %2 = arith.cmpi ne, %1, %c0_i32_0 : i32
    scf.if %2 {
      %cst_13 = arith.constant 0.000000e+00 : f32
      %14 = vector.broadcast %cst_13 : f32 to vector<1x128xf32>
      %c0_14 = arith.constant 0 : index
      %c0_15 = arith.constant 0 : index
      %15 = vector.load %arg7[%c0_14, %c0_15] : memref<1x128xf32, #tpu.memory_space<vmem>>, vector<1x128xf32>
      tpu.vector_store %arg7[%c0_14, %c0_15], %14 {strides = array<i32>} : memref<1x128xf32, #tpu.memory_space<vmem>>, vector<1x128xf32>,
    } else {
    }
    %c0 = arith.constant 0 : index
    %c0_1 = arith.constant 0 : index
    %3 = vector.load %arg3[%c0, %c0_1] : memref<1x32xf32, #tpu.memory_space<vmem>>, vector<1x32xf32>
    %c0_2 = arith.constant 0 : index
    %c0_3 = arith.constant 0 : index
    %4 = vector.load %arg4[%c0_2, %c0_3] : memref<32x128xf32, #tpu.memory_space<vmem>>, vector<32x128xf32>
    %cst = arith.constant dense<0.000000e+00> : vector<1x128xf32>
    %5 = tpu.matmul %3, %4, %cst {dimension_numbers = #tpu.dot_dimension_numbers<[1], [0], [0], [1], [0, 0, 1, 1], [], []>} : vector<1x32xf32>, vector<32x128xf32>, vector<1x128xf32> -> vector<1x128xf32>
    %c0_4 = arith.constant 0 : index
    %c0_5 = arith.constant 0 : index
    %6 = vector.load %arg7[%c0_4, %c0_5] : memref<1x128xf32, #tpu.memory_space<vmem>>, vector<1x128xf32>
    %c0_6 = arith.constant 0 : index
    %c0_7 = arith.constant 0 : index
    %7 = vector.load %arg5[%c0_6, %c0_7] : memref<128x128xf32, #tpu.memory_space<vmem>>, vector<128x128xf32>
    %cst_8 = arith.constant dense<0.000000e+00> : vector<1x128xf32>
    %8 = tpu.matmul %5, %7, %cst_8 {dimension_numbers = #tpu.dot_dimension_numbers<[1], [0], [0], [1], [0, 0, 1, 1], [], []>} : vector<1x128xf32>, vector<128x128xf32>, vector<1x128xf32> -> vector<1x128xf32>
    %9 = arith.addf %6, %8 : vector<1x128xf32>
    %c0_9 = arith.constant 0 : index
    %c0_10 = arith.constant 0 : index
    %10 = vector.load %arg7[%c0_9, %c0_10] : memref<1x128xf32, #tpu.memory_space<vmem>>, vector<1x128xf32>
    tpu.vector_store %arg7[%c0_9, %c0_10], %9 {strides = array<i32>} : memref<1x128xf32, #tpu.memory_space<vmem>>, vector<1x128xf32>,
    %c0_i32_11 = arith.constant 0 : i32
    %11 = arith.cmpi eq, %arg1, %c0_i32_11 : i32
    %12 = arith.extui %11 : i1 to i32
    %c0_i32_12 = arith.constant 0 : i32
    %13 = arith.cmpi ne, %12, %c0_i32_12 : i32
    scf.if %13 {
      %c0_13 = arith.constant 0 : index
      %c0_14 = arith.constant 0 : index
      %14 = vector.load %arg7[%c0_13, %c0_14] : memref<1x128xf32, #tpu.memory_space<vmem>>, vector<1x128xf32>
      %c0_15 = arith.constant 0 : index
      %c0_16 = arith.constant 0 : index
      %15 = memref.load %arg2[%c0_15, %c0_16] : memref<1x1xf32, #tpu.memory_space<smem>>
      %16 = vector.broadcast %15 : f32 to vector<1x128xf32>
      %17 = arith.addf %14, %16 : vector<1x128xf32>
      %c0_17 = arith.constant 0 : index
      %c0_18 = arith.constant 0 : index
      %18 = vector.load %arg6[%c0_17, %c0_18] : memref<1x128xf32, #tpu.memory_space<vmem>>, vector<1x128xf32>
      tpu.vector_store %arg6[%c0_17, %c0_18], %17 {strides = array<i32>} : memref<1x128xf32, #tpu.memory_space<vmem>>, vector<1x128xf32>,
    } else {
    }
    return
  }
  func.func @transform_0(%arg0: i32, %arg1: i32) -> (i32, i32) {
    %c0_i32 = arith.constant 0 : i32
    %c0_i32_0 = arith.constant 0 : i32
    %c0_i32_1 = arith.constant 0 : i32
    return %c0_i32, %c0_i32_0 : i32, i32
  }
  func.func @transform_1(%arg0: i32, %arg1: i32) -> (i32, i32) {
    %c0_i32 = arith.constant 0 : i32
    %c0_i32_0 = arith.constant 0 : i32
    %c0_i32_1 = arith.constant 0 : i32
    return %c0_i32, %c0_i32_0 : i32, i32
  }
  func.func @transform_2(%arg0: i32, %arg1: i32) -> (i32, i32) {
    %c0_i32 = arith.constant 0 : i32
    %c0_i32_0 = arith.constant 0 : i32
    return %c0_i32, %arg1 : i32, i32
  }
  func.func @transform_3(%arg0: i32, %arg1: i32) -> (i32, i32) {
    %c0_i32 = arith.constant 0 : i32
    return %arg1, %arg0 : i32, i32
  }
  func.func @transform_4(%arg0: i32, %arg1: i32) -> (i32, i32) {
    %c0_i32 = arith.constant 0 : i32
    %c0_i32_0 = arith.constant 0 : i32
    return %c0_i32, %arg0 : i32, i32
  }
}

</mosaic_0001>

<bundles_post_ra>
// kernel: tpu_custom_call.1
= control target key start
LH: loop header
LB: loop body
LE: loop exit
PB: predicated region body
PF: predicated region fallthrough
CT: control target
= control target key end

     0   :  { %10 = vsyncpa [#allocation5], 0  ;;  %s498_s0 = inlined_call_operand.<no memory space> [shape: f32[1,1], index: 0, kind: input, shape index: {}]   ;;  %s499_s1 = inlined_call_operand.vmem [shape: f32[1,32], index: 1, kind: input, shape index: {}]   ;;  %s500_s2 = inlined_call_operand.hbm [shape: f32[32,128], index: 2, kind: input, shape index: {}]   ;;  %s501_s3 = inlined_call_operand.hbm [shape: f32[128,128], index: 3, kind: input, shape index: {}]   ;;  %s502_s4 = inlined_call_operand.hbm [shape: f32[1,128], index: 4, kind: output, shape index: {}]  }
   0x1   :  { %11 = vsyncpa [#allocation8], 0 }
   0x2   :  { %12 = vsyncpa [#allocation6], 0  ;;  %s423_s15 = smov [#allocation4]   ;;  %s351_s19 = scalar_lea.hbm %s500_s2, 512 }
   0x3   :  { %s22_s16 = sshll.u32 %s423_s15, 4  ;;  %p352_p0 = scmp.ne.s32.totalorder %s500_s2, %s351_s19  ;;  %s23_s16 = int_to_ptr.vmem [resolvable:$true] %s22_s16 }
   0x4   :  { %p355_p1 = scmp.lt.u32.totalorder %s351_s19, %s500_s2 }
   0x6   :  { %p357_p2 = pnand %p355_p1, %p352_p0 }
   0x8   :  { %360 = shalt.err (!%p357_p2)
}
   0x9   :  { %s361_s24 = scalar_lea.vmem %s23_s16, 512  ;;  %p366_p4 = scmp.lt.s32.totalorder %s23_s16, %s23_s16 }
   0xa   :  { %p362_p3 = scmp.ne.s32.totalorder %s23_s16, %s361_s24  ;;  %p367_p5 = scmp.lt.s32.totalorder %s361_s24, %s361_s24 }
   0xc   :  { %p368_p6 = por %p367_p5, %p366_p4 }
   0xe   :  { %p369_p7 = pnand %p368_p6, %p362_p3 }
  0x10   :  { %372 = shalt.err (!%p369_p7)
}
  0x11   :  { %s424_s25 = smov 128   ;;  %s425_s26 = smov 8  }
  0x12   :  { %28 = dma.hbm_to_vmem [thread:$0]  %s500_s2, 512, %s23_s16, [#allocation5], %s424_s25, %s424_s25, %s425_s26  }
  0x13   :  { %s426_s29 = smov [#allocation7]   ;;  %s373_s7 = scalar_lea.hbm %s501_s3, 2048 }
  0x14   :  { %s34_s30 = sshll.u32 %s426_s29, 4  ;;  %p374_p8 = scmp.ne.s32.totalorder %s501_s3, %s373_s7  ;;  %s35_s30 = int_to_ptr.vmem [resolvable:$true] %s34_s30 }
  0x15   :  { %p377_p9 = scmp.lt.u32.totalorder %s373_s7, %s501_s3 }
  0x17   :  { %p379_p10 = pnand %p377_p9, %p374_p8 }
  0x19   :  { %382 = shalt.err (!%p379_p10)
}
  0x1a   :  { %s383_s12 = scalar_lea.vmem %s35_s30, 2048  ;;  %p388_p12 = scmp.lt.s32.totalorder %s35_s30, %s35_s30 }
  0x1b   :  { %p384_p11 = scmp.ne.s32.totalorder %s35_s30, %s383_s12  ;;  %p389_p13 = scmp.lt.s32.totalorder %s383_s12, %s383_s12 }
  0x1d   :  { %p390_p0 = por %p389_p13, %p388_p12 }
  0x1f   :  { %p391_p1 = pnand %p390_p0, %p384_p11 }
  0x21   :  { %394 = shalt.err (!%p391_p1)
}
  0x22   :  { %40 = dma.hbm_to_vmem [thread:$0]  %s501_s3, 2048, %s35_s30, [#allocation8], %s424_s25, %s424_s25, %s425_s26  }
  0x23   :  { %417 = dma.done.wait [#allocation5], 512  }
  0x24   :  { %418 = vsyncadd [#allocation5], 4294966784 }
  0x25   :  { %419 = dma.done.wait [#allocation8], 2048  }
  0x26   :  { %420 = vsyncadd [#allocation8], 4294965248  ;;  %v427_v0 = vmov 0.0|0.0   ;;  %v428_v1 = vmov 0.0   ;;  %vm429_vm0 = vmmov 0   ;;  %v53_v2 = vld [vmem:[#allocation4] sm:$0xff]  ;;  %v225_v39 = vstv %s498_s0 }
  0x27   :  { %313 = vmatprep.subr.bf16.mxu0 %v427_v0  ;;  %51 = vst [vmem:[#allocation2] sm:$0x1] %v428_v1  ;;  %275 = vmatprep.mubr.msk.f32.mxu0 %vm429_vm0, %v428_v1  ;;  %v54_v3 = vld [vmem:[#allocation4 + $0x8] sm:$0xff]  ;;  %v55_v4 = vld [vmem:[#allocation4 + $0x10] sm:$0xff]  ;;  %v56_v6 = vld [vmem:[#allocation4 + $0x18] sm:$0xff]  ;;  %vm57_vm1 = vcmask 261120  }
  0x28   :  { %319 = vmatprep.subr.bf16.mxu1 %v427_v0  ;;  %310 = vmatprep.mubr.msk.f32.mxu1 %vm429_vm0, %v428_v1  ;;  %v314_v5 = vpack.c.bf16 %v54_v3, %v53_v2  ;;  %v132_v7 = vld [vmem:[#allocation7] sm:$0xff]  ;;  %v133_v8 = vld [vmem:[#allocation7 + $0x8] sm:$0xff]  ;;  %v134_v9 = vld [vmem:[#allocation7 + $0x10] sm:$0xff]  ;;  %v317_v11 = vpack.c.bf16 %v56_v6, %v55_v4  ;;  %s430_s16 = smov [#allocation9]  }
  0x29   :  { %v135_v10 = vld [vmem:[#allocation7 + $0x18] sm:$0xff]  ;;  %v320_v12 = vpack.c.bf16 %v133_v8, %v132_v7  ;;  %v136_v14 = vld [vmem:[#allocation7 + $0x20] sm:$0xff]  ;;  %v137_v15 = vld [vmem:[#allocation7 + $0x28] sm:$0xff]  ;;  %s234_s17 = sshll.u32 %s430_s16, 4  ;;  %s235_s17 = int_to_ptr.vmem [resolvable:$true] %s234_s17 }
  0x2a   :  { %315 = vmatpush3.bf16.msra.mxu0 %v314_v5  ;;  %v323_v13 = vpack.c.bf16 %v135_v10, %v134_v9  ;;  %v52_v16 = vld [vmem:[%s499_s1] sm:$0x1]  ;;  %v326_v17 = vpack.c.bf16 %v137_v15, %v136_v14  ;;  %v138_v18 = vld [vmem:[#allocation7 + $0x30] sm:$0xff]  ;;  %v140_v21 = vld [vmem:[#allocation7 + $0x40] sm:$0xff]  ;;  %s395_s18 = scalar_lea.vmem %s235_s17, 16  ;;  %s399_s19 = scalar_lea.vmem %s235_s17, 32 }
  0x2b   :  { %316 = vmatprep.subr.bf16.mxu0 %v427_v0  ;;  %321 = vmatpush3.bf16.msra.mxu1 %v320_v12  ;;  %v139_v19 = vld [vmem:[#allocation7 + $0x38] sm:$0xff]  ;;  %v141_v22 = vld [vmem:[#allocation7 + $0x48] sm:$0xff]  ;;  %v142_v24 = vld [vmem:[#allocation7 + $0x50] sm:$0xff]  ;;  %p396_p2 = scmp.ne.s32.totalorder %s235_s17, %s395_s18  ;;  %p400_p3 = scmp.lt.s32.totalorder %s235_s17, %s235_s17 }
  0x2c   :  { %322 = vmatprep.subr.bf16.mxu1 %v427_v0  ;;  %v329_v20 = vpack.c.bf16 %v139_v19, %v138_v18  ;;  %v332_v23 = vpack.c.bf16 %v141_v22, %v140_v21  ;;  %v143_v25 = vld [vmem:[#allocation7 + $0x58] sm:$0xff]  ;;  %v144_v27 = vld [vmem:[#allocation7 + $0x60] sm:$0xff]  ;;  %v145_v28 = vld [vmem:[#allocation7 + $0x68] sm:$0xff]  ;;  %p401_p4 = scmp.lt.s32.totalorder %s399_s19, %s395_s18 }
  0x2d   :  { %v335_v26 = vpack.c.bf16 %v143_v25, %v142_v24  ;;  %v338_v29 = vpack.c.bf16 %v145_v28, %v144_v27  ;;  %v146_v30 = vld [vmem:[#allocation7 + $0x70] sm:$0xff]  ;;  %v147_v31 = vld [vmem:[#allocation7 + $0x78] sm:$0xff] }
  0x2e   :  { %318 = vmatpush3.bf16.msra.mxu0 %v317_v11  ;;  %v341_v32 = vpack.c.bf16 %v147_v31, %v146_v30  ;;  %v131_v35 = vld [vmem:[#allocation2] sm:$0x1]  ;;  %p402_p5 = por %p401_p4, %p400_p3 }
  0x2f   :  { %324 = vmatpush3.bf16.msra.mxu1 %v323_v13 }
  0x30   :  { %325 = vmatprep.subr.bf16.mxu1 %v427_v0  ;;  %p403_p6 = pnand %p402_p5, %p396_p2 }
  0x31   :  { %276 = vmatmul.mubr.msk.f32.vlgmr.msra.gmra.mrb[0].mxu0 %vm57_vm1, %v52_v16 }
  0x33   :  { %327 = vmatpush3.bf16.msra.mxu1 %v326_v17 }
  0x34   :  { %328 = vmatprep.subr.bf16.mxu1 %v427_v0 }
  0x37   :  { %330 = vmatpush3.bf16.msra.mxu1 %v329_v20 }
  0x38   :  { %331 = vmatprep.subr.bf16.mxu1 %v427_v0 }
  0x3b   :  { %333 = vmatpush3.bf16.msra.mxu1 %v332_v23 }
  0x3c   :  { %334 = vmatprep.subr.bf16.mxu1 %v427_v0 }
  0x3f   :  { %336 = vmatpush3.bf16.msra.mxu1 %v335_v26 }
  0x40   :  { %337 = vmatprep.subr.bf16.mxu1 %v427_v0 }
  0x43   :  { %339 = vmatpush3.bf16.msra.mxu1 %v338_v29 }
  0x44   :  { %340 = vmatprep.subr.bf16.mxu1 %v427_v0 }
  0x47   :  { %342 = vmatpush3.bf16.msra.mxu1 %v341_v32 }
 0x104   :  { %v127_v33 = vpop.f32.mrb[0].mxu0 }
 0x105   :  { %v277_v34 = vpop.f32.mrb[1].mxu0  ;;  %311 = vmatmul.mubr.f32.vlgmr.msra.gmra.mrb[0].mxu1 %v127_v33 }
 0x1d8   :  { %v214_v36 = vpop.f32.mrb[0].mxu1 }
 0x1d9   :  { %v218_v37 = vadd.f32 %v214_v36, %v131_v35  ;;  %v312_v38 = vpop.f32.mrb[1].mxu1 }
 0x1db   :  { %219 = vst [vmem:[#allocation2] sm:$0x1] %v218_v37 }
 0x1e2   :  { %v223_v40 = vld [vmem:[#allocation2] sm:$0x1] }
 0x1e3   :  { %v226_v41 = vadd.f32 %v225_v39, %v223_v40 }
 0x1e5   :  { %227 = vst [vmem:[#allocation9] sm:$0x1] %v226_v41 }
 0x1e6   :  { %406 = shalt.err (!%p403_p6)
}
 0x1e7   :  { %s407_s22 = scalar_lea.hbm %s502_s4, 16 }
 0x1e8   :  { %p408_p7 = scmp.ne.s32.totalorder %s502_s4, %s407_s22  ;;  %p411_p8 = scmp.lt.u32.totalorder %s407_s22, %s502_s4 }
 0x1ea   :  { %p413_p9 = pnand %p411_p8, %p408_p7 }
 0x1ec   :  { %416 = shalt.err (!%p413_p9)
}
 0x1ed   :  { %237 = dma.vmem_to_hbm [thread:$0]  %s235_s17, 16, %s502_s4, [#allocation6]  }
 0x1ee   :  { %421 = dma.done.wait [#allocation6], 16  }
 0x1ef   :  { %422 = vsyncadd [#allocation6], 4294967280 }
 0x1f0   :  { %241 = vsyncpa [#allocation5], 1 }
 0x1f1   :  { %242 = vsyncpa [#allocation8], 1 }
 0x1f2   :  { %243 = vsyncpa [#allocation6], 1 }

</bundles_post_ra>
